<compile_context>
chip_gen: v6e
topology: v6e:2x2x1
jax: 0.10.0
libtpu: 0.0.40
codegen_flags: <defaults>
</compile_context>

<pallas_src>
import functools

import jax
import jax.numpy as jnp
from jax.experimental import pallas as pl
from jax.experimental.pallas import tpu as pltpu


def _sb_norm_conv_kernel(x_ref, gb_ref, w_ref, b_ref, o_ref, *, inv_hw):
    eps = 1e-5
    x = x_ref[...].astype(jnp.float32)                       # (R, HW), R = TB*C
    g1 = gb_ref[:, 0:1]                                      # (R, 1) = 1 + gamma
    bt = gb_ref[:, 1:2]                                      # (R, 1) = beta

    # ---- InstanceNorm2d per row (single pass), folded with gamma/beta ----
    mean = jnp.sum(x, axis=1, keepdims=True) * inv_hw        # (R, 1) lane reduce
    ex2 = jnp.sum(x * x, axis=1, keepdims=True) * inv_hw     # (R, 1)
    var = jnp.maximum(ex2 - mean * mean, 0.0)                # clamp cancellation
    inv_std = jax.lax.rsqrt(var + eps)
    scale = g1 * inv_std                                     # (R, 1)
    shift = bt - scale * mean                                # (R, 1)
    x_mod = x * scale + shift                                # (R, HW)

    # ---- 1x1 conv for all TB images at once: block-diagonal MXU dot ----
    y = jnp.dot(w_ref[...], x_mod, preferred_element_type=jnp.float32)
    y = y + b_ref[...]                                       # (TB*out_dim, HW)

    # sigmoid(y) == 0.5 * (tanh(y/2) + 1): one EUP push per element.
    o_ref[...] = (0.5 * (jnp.tanh(0.5 * y) + 1.0)).astype(o_ref.dtype)


def _choose_tb(n, c, out_dim, hw, x_itemsize, o_itemsize):
    """Images per grid step: TB | N, TB*C and TB*out_dim multiples of 8
    (or grid==1, where the block equals the full array), block fits VMEM."""
    vmem_budget = 8 * 1024 * 1024  # conservative double-buffered x+out budget

    def blk_bytes(tb):
        return 2 * tb * hw * (c * x_itemsize + out_dim * o_itemsize)

    divisors = [d for d in range(1, n + 1) if n % d == 0]

    def legal(tb):
        if n // tb == 1:
            return True  # block shape equals full array dims
        return (tb * c) % 8 == 0 and (tb * out_dim) % 8 == 0

    legal_divs = [d for d in divisors if legal(d)]
    fitting = [d for d in legal_divs if blk_bytes(d) <= vmem_budget]
    if fitting:
        return max(fitting)
    return min(legal_divs)


def sb_layer(x, s, w1, b1, w2, b2, w3, b3, wc, bc):
    """x: (N, C, H, W); s: (N, style_dim); fc weights (out, in); wc: (out_dim, C, 1, 1)."""
    N, C, H, W = x.shape
    F2 = w1.shape[0]              # 2 * num_features
    F = F2 // 2
    assert F == C, "num_features must match the channel count of x"
    out_dim = wc.shape[0]
    HW = H * W
    f32 = jnp.float32

    # ---- style MLP for the whole batch (tiny; batched XLA matmuls) ----
    h = jnp.maximum(s.astype(f32) @ w1.astype(f32).T + b1.astype(f32), 0.0)
    h = jnp.maximum(h @ w2.astype(f32).T + b2.astype(f32), 0.0)
    h = h @ w3.astype(f32).T + b3.astype(f32)                      # (N, 2F)
    gamma = h[:, :F]
    beta = h[:, F:]
    # per-row (image*channel) modulation, packed as one small operand
    gb = jnp.stack([1.0 + gamma, beta], axis=-1).reshape(N * C, 2)  # (N*C, 2)

    # ---- lane-dense, native-dtype x view: free reshape of NCHW ----
    x_flat = x.reshape(N * C, HW)

    TB = _choose_tb(N, C, out_dim, HW, x.dtype.itemsize, x.dtype.itemsize)
    grid = (N // TB,)
    R = TB * C                     # rows of x per grid step
    RO = TB * out_dim              # rows of output per grid step

    # Block-diagonal 1x1-conv weight covering TB images in one MXU dot.
    wc2d = wc.reshape(out_dim, C).astype(f32)
    w_big = jnp.kron(jnp.eye(TB, dtype=f32), wc2d)                 # (RO, R)
    b_big = jnp.tile(bc.astype(f32).reshape(out_dim, 1), (TB, 1))  # (RO, 1)

    kernel = functools.partial(_sb_norm_conv_kernel, inv_hw=float(1.0 / HW))

    out_flat = pl.pallas_call(
        kernel,
        out_shape=jax.ShapeDtypeStruct((N * out_dim, HW), x.dtype),
        grid_spec=pltpu.PrefetchScalarGridSpec(
            num_scalar_prefetch=0,
            grid=grid,
            in_specs=[
                pl.BlockSpec((R, HW), lambda n: (n, 0)),      # x rows for TB images
                pl.BlockSpec((R, 2), lambda n: (n, 0)),       # (1+gamma, beta) per row
                pl.BlockSpec((RO, R), lambda n: (0, 0)),      # block-diag conv weight
                pl.BlockSpec((RO, 1), lambda n: (0, 0)),      # conv bias (column)
            ],
            out_specs=pl.BlockSpec((RO, HW), lambda n: (n, 0)),
        ),
        compiler_params=pltpu.CompilerParams(
            dimension_semantics=("parallel",)),
    )(x_flat, gb, w_big, b_big)

    return out_flat.reshape(N, out_dim, H, W)


def _reference(x, s, w1, b1, w2, b2, w3, b3, wc, bc):
    """Pure-JAX reference matching the PyTorch SBLayer semantics (NCHW)."""
    eps = 1e-5
    h = jnp.maximum(s @ w1.T + b1, 0.0)
    h = jnp.maximum(h @ w2.T + b2, 0.0)
    h = h @ w3.T + b3
    f = h.shape[1] // 2
    gamma = h[:, :f][:, :, None, None]
    beta = h[:, f:][:, :, None, None]
    mean = jnp.mean(x, axis=(2, 3), keepdims=True)
    var = jnp.mean((x - mean) ** 2, axis=(2, 3), keepdims=True)
    xn = (x - mean) * jax.lax.rsqrt(var + eps)
    xm = (1.0 + gamma) * xn + beta
    wc2d = wc.reshape(wc.shape[0], wc.shape[1])
    y = jnp.einsum("oc,nchw->nohw", wc2d, xm) + bc.reshape(1, -1, 1, 1)
    return jax.nn.sigmoid(y)


if __name__ == "__main__":
    key = jax.random.PRNGKey(0)
    N, C, H, W = 2, 4, 16, 16       # x: (batch, num_features, H, W)
    S = 8                           # style_dim
    out_dim = 8                     # conv output channels
    F2 = 2 * C

    keys = jax.random.split(key, 10)
    x = jax.random.normal(keys[0], (N, C, H, W), jnp.float32)
    s = jax.random.normal(keys[1], (N, S), jnp.float32)
    w1 = 0.3 * jax.random.normal(keys[2], (F2, S), jnp.float32)
    b1 = 0.1 * jax.random.normal(keys[3], (F2,), jnp.float32)
    w2 = 0.3 * jax.random.normal(keys[4], (F2, F2), jnp.float32)
    b2 = 0.1 * jax.random.normal(keys[5], (F2,), jnp.float32)
    w3 = 0.3 * jax.random.normal(keys[6], (F2, F2), jnp.float32)
    b3 = 0.1 * jax.random.normal(keys[7], (F2,), jnp.float32)
    wc = 0.3 * jax.random.normal(keys[8], (out_dim, C, 1, 1), jnp.float32)
    bc = 0.1 * jax.random.normal(keys[9], (out_dim,), jnp.float32)

    out = sb_layer(x, s, w1, b1, w2, b2, w3, b3, wc, bc)
    out = jax.block_until_ready(out)

    ref = jax.block_until_ready(_reference(x, s, w1, b1, w2, b2, w3, b3, wc, bc))
    assert out.shape == (N, out_dim, H, W)
    assert jnp.allclose(out, ref, atol=1e-3, rtol=1e-3), \
        float(jnp.max(jnp.abs(out - ref)))

    print("KERNEL_OK")
</pallas_src>

<mosaic_0001>
module attributes {stable_mosaic.version = 11 : i64} {
  func.func @_sb_norm_conv_kernel(%arg0: i32, %arg1: memref<8x256xf32, #tpu.memory_space<vmem>>, %arg2: memref<8x2xf32, #tpu.memory_space<vmem>>, %arg3: memref<16x8xf32, #tpu.memory_space<vmem>>, %arg4: memref<16x1xf32, #tpu.memory_space<vmem>>, %arg5: memref<16x256xf32, #tpu.memory_space<vmem>>) attributes {dimension_semantics = [#tpu.dimension_semantics<parallel>], iteration_bounds = array<i64: 1>, scalar_prefetch = 0 : i64, scratch_operands = 0 : i64, tpu.core_type = #tpu.core_type<tc>, window_params = [{transform_indices = @transform_0, window_bounds = array<i64: 8, 256>}, {transform_indices = @transform_1, window_bounds = array<i64: 8, 2>}, {pipeline_mode = #tpu.pipeline_mode<synchronous>, transform_indices = @transform_2, window_bounds = array<i64: 16, 8>}, {pipeline_mode = #tpu.pipeline_mode<synchronous>, transform_indices = @transform_3, window_bounds = array<i64: 16, 1>}, {transform_indices = @transform_4, window_bounds = array<i64: 16, 256>}]} {
    %c0 = arith.constant 0 : index
    %c0_0 = arith.constant 0 : index
    %0 = vector.load %arg1[%c0, %c0_0] : memref<8x256xf32, #tpu.memory_space<vmem>>, vector<8x256xf32>
    %c0_1 = arith.constant 0 : index
    %c0_2 = arith.constant 0 : index
    %1 = vector.load %arg2[%c0_1, %c0_2] : memref<8x2xf32, #tpu.memory_space<vmem>>, vector<8x1xf32>
    %c0_3 = arith.constant 0 : index
    %c1 = arith.constant 1 : index
    %2 = vector.load %arg2[%c0_3, %c1] : memref<8x2xf32, #tpu.memory_space<vmem>>, vector<8x1xf32>
    %cst = arith.constant dense<0.000000e+00> : vector<8xf32>
    %3 = vector.multi_reduction <add>, %0, %cst [1] : vector<8x256xf32> to vector<8xf32>
    %4 = vector.shape_cast %3 : vector<8xf32> to vector<8x1xf32>
    %cst_4 = arith.constant 3.906250e-03 : f32
    %5 = vector.broadcast %cst_4 : f32 to vector<8x1xf32>
    %6 = arith.mulf %4, %5 : vector<8x1xf32>
    %7 = arith.mulf %0, %0 : vector<8x256xf32>
    %cst_5 = arith.constant dense<0.000000e+00> : vector<8xf32>
    %8 = vector.multi_reduction <add>, %7, %cst_5 [1] : vector<8x256xf32> to vector<8xf32>
    %9 = vector.shape_cast %8 : vector<8xf32> to vector<8x1xf32>
    %cst_6 = arith.constant 3.906250e-03 : f32
    %10 = vector.broadcast %cst_6 : f32 to vector<8x1xf32>
    %11 = arith.mulf %9, %10 : vector<8x1xf32>
    %12 = arith.mulf %6, %6 : vector<8x1xf32>
    %13 = arith.subf %11, %12 : vector<8x1xf32>
    %cst_7 = arith.constant 0.000000e+00 : f32
    %14 = vector.broadcast %cst_7 : f32 to vector<8x1xf32>
    %15 = arith.maximumf %13, %14 : vector<8x1xf32>
    %cst_8 = arith.constant 9.99999974E-6 : f32
    %16 = vector.broadcast %cst_8 : f32 to vector<8x1xf32>
    %17 = arith.addf %15, %16 : vector<8x1xf32>
    %18 = math.rsqrt %17 : vector<8x1xf32>
    %19 = arith.mulf %1, %18 : vector<8x1xf32>
    %20 = arith.mulf %19, %6 : vector<8x1xf32>
    %21 = arith.subf %2, %20 : vector<8x1xf32>
    %22 = vector.broadcast %19 : vector<8x1xf32> to vector<8x256xf32>
    %23 = arith.mulf %0, %22 : vector<8x256xf32>
    %24 = vector.broadcast %21 : vector<8x1xf32> to vector<8x256xf32>
    %25 = arith.addf %23, %24 : vector<8x256xf32>
    %c0_9 = arith.constant 0 : index
    %c0_10 = arith.constant 0 : index
    %26 = vector.load %arg3[%c0_9, %c0_10] : memref<16x8xf32, #tpu.memory_space<vmem>>, vector<16x8xf32>
    %cst_11 = arith.constant dense<0.000000e+00> : vector<16x256xf32>
    %27 = tpu.matmul %26, %25, %cst_11 {dimension_numbers = #tpu.dot_dimension_numbers<[1], [0], [0], [1], [0, 0, 1, 1], [], []>} : vector<16x8xf32>, vector<8x256xf32>, vector<16x256xf32> -> vector<16x256xf32>
    %c0_12 = arith.constant 0 : index
    %c0_13 = arith.constant 0 : index
    %28 = vector.load %arg4[%c0_12, %c0_13] : memref<16x1xf32, #tpu.memory_space<vmem>>, vector<16x1xf32>
    %29 = vector.broadcast %28 : vector<16x1xf32> to vector<16x256xf32>
    %30 = arith.addf %27, %29 : vector<16x256xf32>
    %cst_14 = arith.constant 5.000000e-01 : f32
    %31 = vector.broadcast %cst_14 : f32 to vector<16x256xf32>
    %32 = arith.mulf %31, %30 : vector<16x256xf32>
    %33 = math.tanh %32 : vector<16x256xf32>
    %cst_15 = arith.constant 1.000000e+00 : f32
    %34 = vector.broadcast %cst_15 : f32 to vector<16x256xf32>
    %35 = arith.addf %33, %34 : vector<16x256xf32>
    %cst_16 = arith.constant 5.000000e-01 : f32
    %36 = vector.broadcast %cst_16 : f32 to vector<16x256xf32>
    %37 = arith.mulf %36, %35 : vector<16x256xf32>
    %c0_17 = arith.constant 0 : index
    %c0_18 = arith.constant 0 : index
    %38 = vector.load %arg5[%c0_17, %c0_18] : memref<16x256xf32, #tpu.memory_space<vmem>>, vector<16x256xf32>
    tpu.vector_store %arg5[%c0_17, %c0_18], %37 {strides = array<i32>} : memref<16x256xf32, #tpu.memory_space<vmem>>, vector<16x256xf32>,
    return
  }
  func.func @transform_0(%arg0: i32) -> (i32, i32) {
    %c0_i32 = arith.constant 0 : i32
    %c0_i32_0 = arith.constant 0 : i32
    return %arg0, %c0_i32 : i32, i32
  }
  func.func @transform_1(%arg0: i32) -> (i32, i32) {
    %c0_i32 = arith.constant 0 : i32
    %c0_i32_0 = arith.constant 0 : i32
    return %arg0, %c0_i32 : i32, i32
  }
  func.func @transform_2(%arg0: i32) -> (i32, i32) {
    %c0_i32 = arith.constant 0 : i32
    %c0_i32_0 = arith.constant 0 : i32
    %c0_i32_1 = arith.constant 0 : i32
    return %c0_i32, %c0_i32_0 : i32, i32
  }
  func.func @transform_3(%arg0: i32) -> (i32, i32) {
    %c0_i32 = arith.constant 0 : i32
    %c0_i32_0 = arith.constant 0 : i32
    %c0_i32_1 = arith.constant 0 : i32
    return %c0_i32, %c0_i32_0 : i32, i32
  }
  func.func @transform_4(%arg0: i32) -> (i32, i32) {
    %c0_i32 = arith.constant 0 : i32
    %c0_i32_0 = arith.constant 0 : i32
    return %arg0, %c0_i32 : i32, i32
  }
}

</mosaic_0001>

<bundles_post_ra>
// kernel: tpu_custom_call.1
= control target key start
LH: loop header
LB: loop body
LE: loop exit
PB: predicated region body
PF: predicated region fallthrough
CT: control target
= control target key end

     0   :  { %s293_s0 = inlined_call_operand.vmem [shape: f32[8,256], index: 0, kind: input, shape index: {}]   ;;  %s294_s1 = inlined_call_operand.vmem [shape: f32[8,2], index: 1, kind: input, shape index: {}]   ;;  %s295_s2 = inlined_call_operand.vmem [shape: f32[16,8], index: 2, kind: input, shape index: {}]   ;;  %s296_s3 = inlined_call_operand.vmem [shape: f32[16,1], index: 3, kind: input, shape index: {}]   ;;  %s297_s4 = inlined_call_operand.hbm [shape: f32[16,256], index: 4, kind: output, shape index: {}]  }
   0x1   :  { %v18_v0 = vld [vmem:[%s293_s0] sm:$0xff]  ;;  %v19_v1 = vld [vmem:[%s293_s0 + $0x8] sm:$0xff] }
   0x2   :  { %9 = vsyncpa [#allocation3], 0  ;;  %v21_v2 = vadd.f32 %v19_v1, %v18_v0  ;;  %v25_v3 = vmul.f32 %v18_v0, %v18_v0  ;;  %v26_v4 = vmul.f32 %v19_v1, %v19_v1  ;;  %v237_v6 = vmov 0   ;;  %v20_v16 = vld [vmem:[%s294_s1] sm:$0xff]  ;;  %s239_s20 = smov 1   ;;  %v60_v21 = vld [vmem:[%s296_s3 + $0x8] sm:$0xff] }
   0x3   :  { %202 = vset.pattern.permute.xlu1 %v237_v6  ;;  %v238_v15 = vmov 1   ;;  %v59_v20 = vld [vmem:[%s296_s3] sm:$0xff]  ;;  %v240_v24 = vmov 0.0   ;;  %vm71_vm0 = vcmask 64512   ;;  %v58_v32 = vld [vmem:[%s295_s2 + $0x8] sm:$0xff] }
   0x4   :  { %22 = vadd.xlane.f32.xlu0 %v21_v2  ;;  %v27_v5 = vadd.f32 %v26_v4, %v25_v3  ;;  %142 = vmatprep.mubr.f32.mxu0 %v240_v24  ;;  %v57_v31 = vld [vmem:[%s295_s2] sm:$0xff]  ;;  %s241_s2 = smov [#allocation2]  }
   0x5   :  { %203 = vset.pattern.permute.xlu0 %v238_v15  ;;  %148 = vmatprep.mubr.f32.mxu1 %v240_v24  ;;  %s180_s27 = sshll.u32 %s241_s2, 4  ;;  %s181_s27 = int_to_ptr.vmem [resolvable:$true] %s180_s27 }
   0x6   :  { %s215_s28 = scalar_lea.vmem %s181_s27, 512  ;;  %p220_p1 = scmp.lt.s32.totalorder %s181_s27, %s181_s27 }
   0x7   :  { %p216_p0 = scmp.ne.s32.totalorder %s181_s27, %s215_s28  ;;  %p221_p2 = scmp.lt.s32.totalorder %s215_s28, %s215_s28 }
   0x8   :  { %28 = vadd.xlane.f32.xlu0 %v27_v5 }
   0x9   :  { %p222_p3 = por %p221_p2, %p220_p1 }
   0xb   :  { %p223_p4 = pnand %p222_p3, %p216_p0 }
  0x8d   :  { %v23_v7 = vpop.xlane.xlu0 %22 }
  0x8e   :  { %v24_v8 = vmul.f32 0.00390625, %v23_v7 }
  0x90   :  { %v31_v10 = vmul.f32 %v24_v8, %v24_v8 }
  0x91   :  { %v29_v9 = vpop.xlane.xlu0 %28 }
  0x92   :  { %v30_v11 = vmul.f32 0.00390625, %v29_v9 }
  0x94   :  { %v32_v12 = vsub.f32 %v30_v11, %v31_v10 }
  0x96   :  { %v33_v13 = vmax.f32 %v32_v12, 0.0 }
  0x98   :  { %v34_v14 = vadd.f32 1e-05, %v33_v13 }
  0x9a   :  { %205 = vrsqrt.f32 %v34_v14 }
  0xa7   :  { %v206_v17 = vpop.eup %205 }
  0xa8   :  { %v36_v18 = vmul.f32 %v206_v17, %v20_v16 }
  0xaa   :  { %v37_v19 = vmul.f32 %v36_v18, %v24_v8 }
  0xac   :  { %39 = vrot.lane.b32.xlu1 %v37_v19, %s239_s20 }
  0xb0   :  { %45 = vperm.xlu1 %202, %v36_v18  }
  0xb4   :  { %63 = vperm.xlu1 %202, %v59_v20  }
  0xb8   :  { %68 = vperm.xlu1 %202, %v60_v21  }
 0x11e   :  { %v40_v22 = vpop.permute.xlu1 %39 }
 0x11f   :  { %v42_v23 = vsub.f32 %v20_v16, %v40_v22 }
 0x121   :  { %52 = vperm.xlu0 %203, %v42_v23  }
 0x125   :  { %204 = vset.pattern.permute.xlu0 %v237_v6 }
 0x12b   :  { %v46_v25 = vpop.permute.xlu1 %45 }
 0x12c   :  { %v48_v26 = vmul.f32 %v46_v25, %v18_v0  ;;  %v49_v27 = vmul.f32 %v46_v25, %v19_v1 }
 0x12f   :  { %v64_v33 = vpop.permute.xlu1 %63 }
 0x133   :  { %v69_v34 = vpop.permute.xlu1 %68 }
 0x19c   :  { %v53_v28 = vpop.permute.xlu0 %52 }
 0x19d   :  { %v55_v29 = vadd.f32 %v53_v28, %v48_v26  ;;  %v56_v30 = vadd.f32 %v53_v28, %v49_v27 }
 0x19f   :  { %108 = vmatprep.subr.mxu0 %v56_v30  ;;  %193 = vmatprep.subr.mxu1 %v56_v30 }
 0x1a0   :  { %109 = vmatpush1.msra.mxu0 %v55_v29  ;;  %194 = vmatpush1.msra.mxu1 %v55_v29 }
 0x1a1   :  { %191 = vmatmul.mubr.msk.f32.vlgmr.msra.gmra.mxu0 %vm71_vm0, %v57_v31  ;;  %192 = vmatmul.mubr.msk.f32.vlgmr.msra.gmra.mxu1 %vm71_vm0, %v58_v32 }
 0x261   :  { %v144_v35 = vpop.f32.mrf.mxu0  ;;  %v150_v36 = vpop.f32.mrf.mxu1 }
 0x262   :  { %v145_v37 = vadd.f32 %v144_v35, %v64_v33  ;;  %v151_v38 = vadd.f32 %v150_v36, %v69_v34 }
 0x263   :  { %v146_v39 = vpop.f32.mrf.mxu0  ;;  %v152_v40 = vpop.f32.mrf.mxu1 }
 0x264   :  { %v155_v41 = vmul.f32 0.5, %v145_v37  ;;  %v157_v42 = vmul.f32 0.5, %v151_v38  ;;  %v147_v43 = vadd.f32 %v146_v39, %v64_v33  ;;  %v153_v44 = vadd.f32 %v152_v40, %v69_v34 }
 0x266   :  { %207 = vtanh.f32 %v155_v41  ;;  %v156_v45 = vmul.f32 0.5, %v147_v43  ;;  %v158_v46 = vmul.f32 0.5, %v153_v44 }
 0x267   :  { %209 = vtanh.f32 %v157_v42 }
 0x268   :  { %211 = vtanh.f32 %v156_v45 }
 0x269   :  { %213 = vtanh.f32 %v158_v46 }
 0x273   :  { %v208_v47 = vpop.eup %207 }
 0x274   :  { %v210_v48 = vpop.eup %209  ;;  %v163_v49 = vadd.f32 1.0, %v208_v47 }
 0x275   :  { %v212_v50 = vpop.eup %211  ;;  %v165_v51 = vadd.f32 1.0, %v210_v48 }
 0x276   :  { %v214_v52 = vpop.eup %213  ;;  %v167_v53 = vmul.f32 0.5, %v163_v49  ;;  %v164_v54 = vadd.f32 1.0, %v212_v50 }
 0x277   :  { %v169_v55 = vmul.f32 0.5, %v165_v51  ;;  %v166_v56 = vadd.f32 1.0, %v214_v52 }
 0x278   :  { %171 = vst [vmem:[#allocation2] sm:$0xff] %v167_v53  ;;  %v168_v57 = vmul.f32 0.5, %v164_v54 }
 0x279   :  { %173 = vst [vmem:[#allocation2 + $0x10] sm:$0xff] %v169_v55  ;;  %v170_v58 = vmul.f32 0.5, %v166_v56 }
 0x27a   :  { %172 = vst [vmem:[#allocation2 + $0x8] sm:$0xff] %v168_v57 }
 0x27b   :  { %174 = vst [vmem:[#allocation2 + $0x18] sm:$0xff] %v170_v58 }
 0x27c   :  { %226 = shalt.err (!%p223_p4)
}
 0x27d   :  { %s242_s29 = smov 256   ;;  %s243_s30 = smov 16  }
 0x27e   :  { %186 = dma.vmem_to_hbm [thread:$0]  %s181_s27, 512, %s297_s4, [#allocation3], %s242_s29, %s242_s29, %s243_s30  }
 0x27f   :  { %235 = dma.done.wait [#allocation3], 512  }
 0x280   :  { %236 = vsyncadd [#allocation3], 4294966784 }
 0x281   :  { %190 = vsyncpa [#allocation3], 1 }

</bundles_post_ra>
